<compile_context>
chip_gen: v6e
topology: v6e:2x2x1
jax: 0.10.0
libtpu: 0.0.40
codegen_flags: <defaults>
</compile_context>

<pallas_src>
import math

import jax
import jax.numpy as jnp
from jax.experimental import pallas as pl
from jax.experimental.pallas import tpu as pltpu


LOG_10000 = math.log(10000.0)


def _bcast_kernel(pe_ref, o_ref):
    """pe_ref: (1, tC) slice of the flattened pe table (resident across the
    inner batch sweep); o_ref: (tB, tC) output block.  Pure sublane broadcast
    + lane-dense full-width stores (HBM-write bound)."""
    o_ref[...] = jnp.broadcast_to(pe_ref[...], o_ref.shape)


def _pick_tiles(B, SL, target_bytes=3 << 20):
    """Pick (tB, tC) block dims for the flattened (B, SL) f32 output.

    TPU (8,128) rule on the last two block dims:
      * tC must be a multiple of 128, or equal SL (full extent)
      * tB must be a multiple of 8,   or equal B  (full extent)
    Targets ~3 MiB per output block (amortizes the ~0.35 us grid-step
    overhead; fits v5e's 16 MiB scoped default with double-buffering)."""
    budget_elems = max(128, target_bytes // 4)

    def lane_tile(max_elems):
        # Largest multiple-of-128 divisor of SL that is <= max_elems.
        # (128 always divides SL here, so this terminates with a divisor.)
        t = min(SL, max(128, (max_elems // 128) * 128))
        while t > 128 and SL % t != 0:
            t -= 128
        return t

    if SL <= budget_elems or SL % 128 != 0:
        tC = SL                       # full extent (legal even if SL % 128 != 0)
    else:
        tC = lane_tile(budget_elems)

    max_rows = budget_elems // max(1, tC)
    if B <= max(1, max_rows):
        tB = B                        # full extent
    elif max_rows >= 8:
        tB = (max_rows // 8) * 8      # sublane-aligned; grid uses cdiv, so tB
                                      # need not divide B (no full-S fallback)
    else:
        # Batch must be tiled but <8 rows fit: shrink the lane tile so an
        # 8-row (sublane-aligned) block stays inside the budget.
        tB = 8
        if SL % 128 == 0:
            tC = lane_tile(max(128, budget_elems // 8))

    # Megacore / v7x 2-TC: avoid a single-step grid when it can be split on
    # an aligned boundary.
    if tB >= B and tC == SL:
        if SL % 256 == 0:
            tC = SL // 2
        elif B % 16 == 0:
            tB = B // 2
    return tB, tC


def positional_encoding_forward(x, max_len=100):
    """Pallas equivalent of PositionalEncoding(embed_dim, max_len).forward(x).

    x: (B, S, N, D) array. Only its shape is used (the PyTorch forward ignores
    x's values). Returns float32 array of shape (B, S, N, D)."""
    B, S, N, D = x.shape
    assert S <= max_len, (S, max_len)
    assert D % 2 == 0, "embed_dim must be even (as in the PyTorch module)"

    # --- batch-invariant pe table, built once outside the grid loop ---------
    position = jnp.arange(S, dtype=jnp.float32)[:, None]                   # (S, 1)
    div_term = jnp.exp(
        jnp.arange(0, D, 2, dtype=jnp.float32) * (-LOG_10000 / D))         # (D/2,)
    angles = position * div_term                                           # (S, D/2)
    # interleave: pe[:, 0::2] = sin, pe[:, 1::2] = cos (matches PyTorch buffer)
    pe = jnp.stack([jnp.sin(angles), jnp.cos(angles)], axis=-1).reshape(S, D)
    # Pre-tile over N and flatten so the kernel output is one lane-dense axis:
    # pe_flat[0, s*N*D + n*D + d] == pe[s, d]
    SL = S * N * D
    pe_flat = jnp.tile(pe, (1, N)).reshape(1, SL)

    tB, tC = _pick_tiles(B, SL)
    n_b = pl.cdiv(B, tB)          # edge block (if any) is masked by Pallas
    n_c = SL // tC                # tC always divides SL by construction

    cost = pl.CostEstimate(
        flops=0, transcendentals=0,
        bytes_accessed=B * SL * 4 + SL * 4)
    cparams = pltpu.CompilerParams(
        dimension_semantics=("parallel", "parallel"),
        vmem_limit_bytes=32 * 1024 * 1024)

    def _run(pe_spec):
        return pl.pallas_call(
            _bcast_kernel,
            out_shape=jax.ShapeDtypeStruct((B, SL), jnp.float32),
            grid=(n_c, n_b),      # batch innermost -> pe tile stays resident
            in_specs=[pe_spec],
            out_specs=pl.BlockSpec((tB, tC), lambda c, b: (b, c)),
            compiler_params=cparams,
            cost_estimate=cost,
        )(pe_flat)

    try:
        # pe's block index is constant across the inner sweep -> single-buffer
        # it; the reclaimed VMEM goes to the (double-buffered) output blocks.
        out_flat = _run(pl.BlockSpec((1, tC), lambda c, b: (0, c),
                                     pipeline_mode=pl.Buffered(1)))
    except Exception:
        # Fallback for jax versions without pipeline_mode / Buffered(1).
        out_flat = _run(pl.BlockSpec((1, tC), lambda c, b: (0, c)))

    # TODO(synk): highest system-level win would be fusing the downstream
    # `x + pe` add (and bf16 output) into this kernel, but that changes the
    # module's forward contract (it returns only the broadcast table).
    return out_flat.reshape(B, S, N, D)


def _reference_pe(x, max_len=100):
    """Plain-JAX reproduction of the PyTorch module (for verification)."""
    B, S, N, D = x.shape
    position = jnp.arange(max_len, dtype=jnp.float32)[:, None]             # (L, 1)
    div_term = jnp.exp(
        jnp.arange(0, D, 2, dtype=jnp.float32) * -(LOG_10000 / D))         # (D/2,)
    pe = jnp.zeros((max_len, D), jnp.float32)
    pe = pe.at[:, 0::2].set(jnp.sin(position * div_term))
    pe = pe.at[:, 1::2].set(jnp.cos(position * div_term))
    return jnp.broadcast_to(pe[None, :S, None, :], (B, S, N, D))


if __name__ == "__main__":
    key = jax.random.PRNGKey(0)
    # x: (batch=2, seq=8, N=4, embed_dim=32) — forward only uses the shape.
    B, S, N, D = 2, 8, 4, 32
    x = jax.random.normal(key, (B, S, N, D), dtype=jnp.float32)

    out = positional_encoding_forward(x)
    out = jax.block_until_ready(out)

    ref = _reference_pe(x)
    assert out.shape == x.shape, (out.shape, x.shape)
    assert out.dtype == jnp.float32
    assert jnp.allclose(out, ref, atol=1e-5, rtol=1e-5), "mismatch vs reference"

    print("KERNEL_OK")
</pallas_src>

<mosaic_0001>
module attributes {stable_mosaic.version = 11 : i64} {
  func.func @_bcast_kernel(%arg0: i32, %arg1: i32, %arg2: memref<1x512xf32, #tpu.memory_space<vmem>>, %arg3: memref<2x512xf32, #tpu.memory_space<vmem>>) attributes {dimension_semantics = [#tpu.dimension_semantics<parallel>, #tpu.dimension_semantics<parallel>], iteration_bounds = array<i64: 2, 1>, scalar_prefetch = 0 : i64, scratch_operands = 0 : i64, tpu.core_type = #tpu.core_type<tc>, window_params = [{pipeline_mode = #tpu.pipeline_mode<synchronous>, transform_indices = @transform_0, window_bounds = array<i64: 1, 512>}, {transform_indices = @transform_1, window_bounds = array<i64: 2, 512>}]} {
    %c0 = arith.constant 0 : index
    %c0_0 = arith.constant 0 : index
    %0 = vector.load %arg2[%c0, %c0_0] : memref<1x512xf32, #tpu.memory_space<vmem>>, vector<1x512xf32>
    %1 = vector.shape_cast %0 : vector<1x512xf32> to vector<1x512xf32>
    %2 = vector.broadcast %1 : vector<1x512xf32> to vector<2x512xf32>
    %c0_1 = arith.constant 0 : index
    %c0_2 = arith.constant 0 : index
    %3 = vector.load %arg3[%c0_1, %c0_2] : memref<2x512xf32, #tpu.memory_space<vmem>>, vector<2x512xf32>
    tpu.vector_store %arg3[%c0_1, %c0_2], %2 {strides = array<i32>} : memref<2x512xf32, #tpu.memory_space<vmem>>, vector<2x512xf32>,
    return
  }
  func.func @transform_0(%arg0: i32, %arg1: i32) -> (i32, i32) {
    %c0_i32 = arith.constant 0 : i32
    %c0_i32_0 = arith.constant 0 : i32
    return %c0_i32, %arg0 : i32, i32
  }
  func.func @transform_1(%arg0: i32, %arg1: i32) -> (i32, i32) {
    %c0_i32 = arith.constant 0 : i32
    return %arg1, %arg0 : i32, i32
  }
}

module attributes {stable_mosaic.version = 11 : i64} {
  func.func @_bcast_kernel(%arg0: i32, %arg1: i32, %arg2: memref<1x512xf32, #tpu.memory_space<vmem>>, %arg3: memref<2x512xf32, #tpu.memory_space<vmem>>) attributes {dimension_semantics = [#tpu.dimension_semantics<parallel>, #tpu.dimension_semantics<parallel>], iteration_bounds = array<i64: 2, 1>, scalar_prefetch = 0 : i64, scratch_operands = 0 : i64, tpu.core_type = #tpu.core_type<tc>, window_params = [{transform_indices = @transform_0, window_bounds = array<i64: 1, 512>}, {transform_indices = @transform_1, window_bounds = array<i64: 2, 512>}]} {
    %c0 = arith.constant 0 : index
    %c0_0 = arith.constant 0 : index
    %0 = vector.load %arg2[%c0, %c0_0] : memref<1x512xf32, #tpu.memory_space<vmem>>, vector<1x512xf32>
    %1 = vector.shape_cast %0 : vector<1x512xf32> to vector<1x512xf32>
    %2 = vector.broadcast %1 : vector<1x512xf32> to vector<2x512xf32>
    %c0_1 = arith.constant 0 : index
    %c0_2 = arith.constant 0 : index
    %3 = vector.load %arg3[%c0_1, %c0_2] : memref<2x512xf32, #tpu.memory_space<vmem>>, vector<2x512xf32>
    tpu.vector_store %arg3[%c0_1, %c0_2], %2 {strides = array<i32>} : memref<2x512xf32, #tpu.memory_space<vmem>>, vector<2x512xf32>,
    return
  }
  func.func @transform_0(%arg0: i32, %arg1: i32) -> (i32, i32) {
    %c0_i32 = arith.constant 0 : i32
    %c0_i32_0 = arith.constant 0 : i32
    return %c0_i32, %arg0 : i32, i32
  }
  func.func @transform_1(%arg0: i32, %arg1: i32) -> (i32, i32) {
    %c0_i32 = arith.constant 0 : i32
    return %arg1, %arg0 : i32, i32
  }
}

</mosaic_0001>

<bundles_post_ra>
// kernel: tpu_custom_call.1
= control target key start
LH: loop header
LB: loop body
LE: loop exit
PB: predicated region body
PF: predicated region fallthrough
CT: control target
= control target key end

     0   :  { %6 = vsyncpa [#allocation3], 0  ;;  %s594_s0 = inlined_call_operand.hbm [shape: f32[1,1024], index: 0, kind: input, shape index: {}]   ;;  %s595_s1 = inlined_call_operand.hbm [shape: f32[2,1024], index: 1, kind: output, shape index: {}]  }
   0x1   :  { %7 = vsyncpa [#allocation4], 0 }
   0x2   :  { %9 = vsyncpa [#allocation4 + $0x1], 0  ;;  %s458_s6 = smov 0   ;;  %s460_s7 = smov 0  }
   0x3   :  { %s462_s8 = smov 0   ;;  %s464_s9 = smov 0  }
   0x4   :  { %s466_s10 = smov 0   ;;  %s468_s11 = smov 0  }
   0x5 LB: > { %s258_s12 = sadd.s32 4294967295, %s443_s11   ;;  %s259_s13 = sadd.s32 4294967294, %s443_s11   ;;  %s443_s11 = sphi %s468_s11, %s15_s11   ;;  %s439_s10 = sphi %s466_s10, %s613_s10   ;;  %s435_s9 = sphi %s464_s9, %s612_s9   ;;  %s431_s8 = sphi %s462_s8, %s611_s8   ;;  %s427_s7 = sphi %s460_s7, %s610_s7   ;;  %s423_s6 = sphi %s458_s6, %s609_s6  }
   0x6   : > { %s27_s14 = sadd.s32 1, %s439_s10  ;;  %s34_s15 = sadd.s32 1, %s431_s8 }
   0x7   : > { %p29_p0 = scmp.ge.s32.totalorder %s27_s14, 2  ;;  %p47_p1 = scmp.ne.s32.totalorder %s427_s7, %s423_s6 }
   0x8   : > { %p72_p2 = scmp.ne.s32.totalorder %s431_s8, %s427_s7  ;;  %p48_p3 = scmp.eq.s32.totalorder %s258_s12, 0 }
   0x9   : > { %s615_s14 = smov (%p29_p0, %s27_s14), 0  ;;  %p73_p4 = scmp.eq.s32.totalorder %s258_s12, 1 }
   0xa   : > { %s31_s16 = ssub.s32 %s439_s10, %s615_s14  ;;  %p79_p5 = scmp.eq.s32.totalorder %s259_s13, 1 }
   0xb   : > { %p32_p6 = scmp.eq.s32.totalorder %s31_s16, 0  ;;  %p500_p7 = por %p73_p4, %p72_p2 }
   0xc   : > { %p507_p8 = por %p79_p5, %p47_p1  ;;  %p260_p9 = scmp.ge.s32.totalorder %s443_s11, 1 }
   0xd   : > { %s600_s17 = scalar_select %p500_p7, 1, 0 }
   0xe   : > { %s601_s18 = scalar_select %p507_p8, 1, 0 }
   0xf   : > { %s513_s19 = scalar_select %p32_p6, %s431_s8, %s34_s15  }
  0x10   : > { %p86_p10 = scmp.lt.s32.totalorder %s443_s11, 3  ;;  %p519_p11 = por %p48_p3, %p47_p1 }
  0x11   : > { %s270_s22 = sshll.u32 %s435_s9, 6  ;;  %s445_s23 = smov [#allocation2]  }
  0x12   : > { %s602_s20 = scalar_select %p519_p11, 1, 0 }
  0x13   : > { %p523_p12 = pnand %p260_p9, %p86_p10  ;;  %s102_s24 = sshll.u32 %s445_s23, 4  ;;  %s103_s24 = int_to_ptr.vmem [resolvable:$true] %s102_s24 }
  0x14   : > { %s100_s27 = scalar_lea.hbm %s594_s0, %s270_s22  ;;  %s340_s3 = scalar_lea.hbm %s594_s0, 128 }
  0x15   : > { %s603_s21 = scalar_select %p523_p12, 1, 0 }
  0x16   : > { %p276_p13 = pneg %p523_p12  ;;  %s335_s29 = scalar_lea.hbm %s100_s27, 64 }
  0x17   : > { %p336_p1 = scmp.ne.s32.totalorder %s100_s27, %s335_s29  ;;  %p341_p5 = scmp.lt.s32.totalorder %s100_s27, %s594_s0 }
  0x18   : > { %p535_p0 = pnand %p276_p13, %p519_p11  ;;  %p342_p6 = scmp.lt.s32.totalorder %s340_s3, %s335_s29 }
  0x1a   : > { %p337_p2 = pneg %p535_p0  ;;  %p343_p9 = por %p342_p6, %p341_p5 }
  0x1c   : > { %p338_p3 = pnand %p337_p2, %p336_p1 }
  0x1e   : > { %p339_p4 = pneg %p338_p3 }
  0x20   : > { %p344_p10 = pnand %p343_p9, %p339_p4 }
  0x22   : > { %347 = shalt.err (!%p344_p10)
}
  0x23   : > { %s348_s12 = scalar_lea.vmem %s103_s24, 64  ;;  %p356_p11 = scmp.lt.s32.totalorder %s103_s24, %s103_s24 }
  0x24   : > { %p349_p13 = scmp.ne.s32.totalorder %s103_s24, %s348_s12  ;;  %p357_p12 = scmp.lt.s32.totalorder %s348_s12, %s348_s12 }
  0x26   : > { %p351_p8 = pnand %p349_p13, %p337_p2  ;;  %p358_p1 = por %p357_p12, %p356_p11 }
  0x28   : > { %p352_p7 = pneg %p351_p8 }
  0x2a   : > { %p359_p3 = pnand %p358_p1, %p352_p7 }
  0x2c   : > { %362 = shalt.err (!%p359_p3)
}
  0x2d   : > { %279 = dma.hbm_to_vmem [thread:$0]  (!%p535_p0), %s100_s27, 64, %s103_s24, [#allocation3]  }
  0x2e   : > { %p605_p5 = scmp.ne.s32.totalorder %s603_s21, 0 }
  0x2f   : > { %p606_p6 = scmp.ne.s32.totalorder (!%p605_p5), %s602_s20, 0 }
  0x30   : > { %115 = sbr.rel (%p605_p5) target bundleno = 81 (0x51), region = 24 }
  0x35   : > { %414 = dma.done.wait (%p606_p6), [#allocation3], 64  }
  0x36   : > { %416 = vsyncadd (%p606_p6), [#allocation3], 4294967232  ;;  %v134_v0 = vlaneseq  ;;  %v446_v1 = vmov 1983009808   ;;  %s127_s13 = sand.u32 1, %s427_s7   ;;  %s271_s21 = sshll.u32 %s435_s9, 7 }
  0x37   : > { %v153_v2 = vunpack.c.l.s4 %v446_v1  ;;  %s264_s15 = sshll.u32 %s127_s13, 3  ;;  %v132_v9 = vld [vmem:[#allocation2] sm:$0xf]  ;;  %s184_s24 = scalar_lea.hbm %s595_s1, %s271_s21 }
  0x38   : > { %v135_v3 = vshrl.u32 %v134_v0, 7  ;;  %s129_s16 = scalar_lea.vmem [#allocation5], %s264_s15  ;;  %s170_s25 = scalar_lea.sflag [#allocation4], %s127_s13 }
  0x39   : > { %v154_v4 = vunpack.c.0.s8 %v153_v2  ;;  %s186_s20 = sshll.u32 %s129_s16, 4  ;;  %p607_p8 = scmp.ne.s32.totalorder %s600_s17, 0  ;;  %s187_s20 = int_to_ptr.vmem [resolvable:$true] %s186_s20 }
  0x3a   : > { %v136_v5 = vsub.s32 0, %v135_v3  ;;  %v140_v6 = vsub.s32 1, %v135_v3  ;;  %v144_v7 = vsub.s32 2, %v135_v3  ;;  %v148_v8 = vsub.s32 3, %v135_v3  ;;  %s363_s26 = scalar_lea.vmem %s187_s20, 128  ;;  %s447_s27 = smov [#allocation5]  }
  0x3b   : > { %v157_v10 = vsub.s32 %v154_v4, %v135_v3  ;;  %p364_p7 = scmp.ne.s32.totalorder %s187_s20, %s363_s26  ;;  %s367_s28 = sshll.u32 %s447_s27, 4  ;;  %s368_s28 = int_to_ptr.vmem [resolvable:$false] %s367_s28 }
  0x3c   : > { %v137_v11 = vrot.slane %v132_v9, %v136_v5  ;;  %v141_v12 = vrot.slane %v132_v9, %v140_v6  ;;  %v145_v13 = vrot.slane %v132_v9, %v144_v7  ;;  %v149_v14 = vrot.slane %v132_v9, %v148_v8  ;;  %s369_s29 = scalar_lea.vmem %s368_s28, 256  ;;  %p370_p0 = scmp.lt.s32.totalorder %s187_s20, %s368_s28 }
  0x3d   : > { %p365_p11 = pnand %p364_p7, %p607_p8  ;;  %p371_p2 = scmp.lt.s32.totalorder %s369_s29, %s363_s26 }
  0x3e   : > { %v150_v15 = vcombine.low %v137_v11, %v141_v12  ;;  %v151_v16 = vcombine.low %v145_v13, %v149_v14 }
  0x3f   : > { %p366_p12 = pneg %p365_p11  ;;  %p372_p4 = por %p371_p2, %p370_p0 }
  0x40   : > { %v158_v17 = vrot.slane %v150_v15, %v157_v10  ;;  %v165_v18 = vrot.slane %v151_v16, %v157_v10 }
  0x41   : > { %p373_p9 = pnand %p372_p4, %p366_p12 }
  0x42   : > { %v166_v19 = vcombine.low %v158_v17, %v165_v18 }
  0x44   : > { %168 = vst [vmem:[%s129_s16] sm:$0xff] %v166_v19 }
  0x45   : > { %376 = shalt.err (!%p373_p9)
}
  0x46   : > { %s377_s9 = scalar_lea.hbm %s184_s24, 128  ;;  %s381_s3 = scalar_lea.hbm %s595_s1, 256 }
  0x47   : > { %p378_p10 = scmp.ne.s32.totalorder %s184_s24, %s377_s9  ;;  %p382_p3 = scmp.lt.s32.totalorder %s184_s24, %s595_s1 }
  0x48   : > { %p383_p5 = scmp.lt.s32.totalorder %s381_s3, %s377_s9 }
  0x49   : > { %p379_p13 = pnand %p378_p10, %p607_p8 }
  0x4a   : > { %p384_p6 = por %p383_p5, %p382_p3 }
  0x4b   : > { %p380_p1 = pneg %p379_p13 }
  0x4d   : > { %p385_p7 = pnand %p384_p6, %p380_p1 }
  0x4f   : > { %388 = shalt.err (!%p385_p7)
}
  0x50   : > { %274 = dma.vmem_to_hbm [thread:$0]  (%p607_p8), %s187_s20, 128, %s184_s24, %s170_s25  }
  0x51 PF: > { %p284_p11 = scmp.ge.s32.totalorder %s443_s11, 2  ;;  %s198_s12 = sand.u32 1, %s423_s6  }
  0x52   : > { %p608_p12 = scmp.ne.s32.totalorder %s601_s18, 0  ;;  %s199_s13 = scalar_lea.sflag [#allocation4], %s198_s12 }
  0x54   : > { %p281_p0 = pnand %p284_p11, %p608_p12 }
  0x56   : > { %p282_p2 = pneg %p281_p0 }
  0x58   : > { %418 = dma.done.wait (%p282_p2), %s199_s13, 128  }
  0x59   : > { %420 = vsyncadd (%p282_p2), %s199_s13, 4294967168  ;;  %s15_s11 = sadd.s32 1, %s443_s11   ;;  %s609_s6 = smov %s427_s7 }
  0x5a   : > { %p12_p4 = scmp.ge.s32.totalorder %s15_s11, 4   ;;  %s610_s7 = smov %s431_s8 }
  0x5b   : > { %s611_s8 = smov %s513_s19  ;;  %s612_s9 = smov %s439_s10 }
  0x5c   : > { %s613_s10 = smov %s615_s14  ;;  %14 = sbr.rel (!%p12_p4) target bundleno = 5 (0x5), region = 62 }
  0x61   :  { %204 = vsyncpa [#allocation3], 1 }
  0x62   :  { %206 = vsyncpa [#allocation3 + $0x1], 1 }
  0x63   :  { %207 = vsyncpa [#allocation4], 1 }
  0x64   :  { %209 = vsyncpa [#allocation4 + $0x1], 1 }

// kernel: tpu_custom_call.1
= control target key start
LH: loop header
LB: loop body
LE: loop exit
PB: predicated region body
PF: predicated region fallthrough
CT: control target
= control target key end

     0   :  { %6 = vsyncpa [#allocation3], 0  ;;  %s622_s0 = inlined_call_operand.hbm [shape: f32[1,1024], index: 0, kind: input, shape index: {}]   ;;  %s623_s1 = inlined_call_operand.hbm [shape: f32[2,1024], index: 1, kind: output, shape index: {}]  }
   0x1   :  { %8 = vsyncpa [#allocation3 + $0x1], 0 }
   0x2   :  { %9 = vsyncpa [#allocation4], 0 }
   0x3   :  { %11 = vsyncpa [#allocation4 + $0x1], 0  ;;  %s487_s6 = smov 0   ;;  %s489_s7 = smov 0  }
   0x4   :  { %s491_s8 = smov 0   ;;  %s493_s9 = smov 0  }
   0x5   :  { %s495_s10 = smov 0   ;;  %s497_s11 = smov 0  }
   0x6 LB: > { %s284_s12 = sadd.s32 4294967295, %s472_s11   ;;  %s285_s13 = sadd.s32 4294967294, %s472_s11   ;;  %s472_s11 = sphi %s497_s11, %s17_s11   ;;  %s468_s10 = sphi %s495_s10, %s635_s10   ;;  %s464_s9 = sphi %s493_s9, %s634_s9   ;;  %s460_s8 = sphi %s491_s8, %s633_s8   ;;  %s456_s7 = sphi %s489_s7, %s632_s7   ;;  %s452_s6 = sphi %s487_s6, %s631_s6  }
   0x7   : > { %s29_s14 = sadd.s32 1, %s468_s10  ;;  %s36_s15 = sadd.s32 1, %s460_s8 }
   0x8   : > { %p31_p0 = scmp.ge.s32.totalorder %s29_s14, 2  ;;  %p43_p1 = scmp.ne.s32.totalorder %s460_s8, %s456_s7 }
   0x9   : > { %p44_p2 = scmp.eq.s32.totalorder %s472_s11, 0  ;;  %p49_p3 = scmp.ne.s32.totalorder %s456_s7, %s452_s6 }
   0xa   : > { %s637_s14 = smov (%p31_p0, %s29_s14), 0  ;;  %p50_p5 = scmp.eq.s32.totalorder %s284_s12, 0 }
   0xb   : > { %p528_p4 = por %p44_p2, %p43_p1  ;;  %s33_s17 = ssub.s32 %s468_s10, %s637_s14 }
   0xc   : > { %p75_p6 = scmp.eq.s32.totalorder %s284_s12, 1  ;;  %p34_p7 = scmp.eq.s32.totalorder %s33_s17, 0 }
   0xd   : > { %p534_p8 = por %p50_p5, %p49_p3  ;;  %p81_p10 = scmp.eq.s32.totalorder %s285_s13, 1 }
   0xe   : > { %p538_p9 = por %p75_p6, %p43_p1  ;;  %p313_p13 = scmp.lt.s32.totalorder %s472_s11, 2 }
   0xf   : > { %s543_s20 = scalar_select %p34_p7, %s460_s8, %s36_s15  }
  0x10   : > { %p545_p11 = por %p81_p10, %p49_p3  ;;  %s101_s22 = sand.u32 1, %s460_s8  }
  0x11   : > { %s288_s23 = sshll.u32 %s101_s22, 2  ;;  %s299_s24 = sshll.u32 %s468_s10, 6 }
  0x12   : > { %s627_s21 = scalar_select %p545_p11, 1, 0 }
  0x13   : > { %s111_s27 = scalar_lea.hbm %s622_s0, %s299_s24  ;;  %s105_s28 = scalar_lea.vmem [#allocation2], %s288_s23 }
  0x14   : > { %s113_s29 = sshll.u32 %s105_s28, 4  ;;  %p558_p0 = pnand %p313_p13, %p528_p4  ;;  %s114_s29 = int_to_ptr.vmem [resolvable:$true] %s113_s29 }
  0x15   : > { %p291_p1 = scmp.ge.s32.totalorder %s472_s11, 1  ;;  %p118_p2 = scmp.lt.s32.totalorder %s472_s11, 3 }
  0x16   : > { %s102_s2 = scalar_lea.sflag [#allocation3], %s101_s22  ;;  %p366_p3 = pneg %p558_p0 }
  0x17   : > { %s377_s3 = scalar_lea.vmem %s114_s29, 64  ;;  %s474_s4 = smov [#allocation2]  }
  0x18   : > { %p378_p5 = scmp.ne.s32.totalorder %s114_s29, %s377_s3  ;;  %s382_s5 = sshll.u32 %s474_s4, 4  ;;  %s383_s5 = int_to_ptr.vmem [resolvable:$false] %s382_s5 }
  0x19   : > { %s384_s12 = scalar_lea.vmem %s383_s5, 128  ;;  %p385_p10 = scmp.lt.s32.totalorder %s114_s29, %s383_s5 }
  0x1a   : > { %p380_p6 = pnand %p378_p5, %p366_p3  ;;  %p386_p12 = scmp.lt.s32.totalorder %s384_s12, %s377_s3 }
  0x1c   : > { %p381_p7 = pneg %p380_p6  ;;  %p387_p4 = por %p386_p12, %p385_p10 }
  0x1e   : > { %p388_p13 = pnand %p387_p4, %p381_p7 }
  0x20   : > { %391 = shalt.err (!%p388_p13)
}
  0x21   : > { %308 = dma.hbm_to_vmem [thread:$0]  (!%p558_p0), %s111_s27, 64, %s114_s29, %s102_s2  }
  0x22   : > { %p119_p11 = pnand %p291_p1, %p118_p2 }
  0x23   : > { %s573_s13 = sand.u32 (!%p119_p11), 1, %s456_s7  }
  0x24   : > { %122 = sbr.rel (%p119_p11) target bundleno = 69 (0x45), region = 24  ;;  %s292_s15 = sshll.u32 (!%p119_p11), %s573_s13, 2 }
  0x25   : > { %s125_s16 = scalar_lea.sflag (!%p119_p11), [#allocation3], %s573_s13  ;;  %s128_s17 = scalar_lea.vmem (!%p119_p11), [#allocation2], %s292_s15 }
  0x29   : > { %443 = dma.done.wait (%p534_p8), %s125_s16, 64  }
  0x2a   : > { %445 = vsyncadd (%p534_p8), %s125_s16, 4294967232  ;;  %v151_v0 = vlaneseq  ;;  %v475_v1 = vmov 1983009808   ;;  %s293_s22 = sshll.u32 %s573_s13, 3  ;;  %v149_v9 = vld [vmem:[%s128_s17] sm:$0xf] }
  0x2b   : > { %v170_v2 = vunpack.c.l.s4 %v475_v1  ;;  %s146_s18 = scalar_lea.vmem [#allocation5], %s293_s22  ;;  %s300_s24 = sshll.u32 %s464_s9, 7 }
  0x2c   : > { %v152_v3 = vshrl.u32 %v151_v0, 7  ;;  %s203_s23 = sshll.u32 %s146_s18, 4  ;;  %s201_s27 = scalar_lea.hbm %s623_s1, %s300_s24  ;;  %s204_s23 = int_to_ptr.vmem [resolvable:$true] %s203_s23 }
  0x2d   : > { %v171_v4 = vunpack.c.0.s8 %v170_v2  ;;  %s187_s28 = scalar_lea.sflag [#allocation4], %s573_s13  ;;  %s392_s29 = scalar_lea.vmem %s204_s23, 128 }
  0x2e   : > { %v153_v5 = vsub.s32 0, %v152_v3  ;;  %v157_v6 = vsub.s32 1, %v152_v3  ;;  %v161_v7 = vsub.s32 2, %v152_v3  ;;  %v165_v8 = vsub.s32 3, %v152_v3  ;;  %p393_p8 = scmp.ne.s32.totalorder %s204_s23, %s392_s29  ;;  %s476_s30 = smov [#allocation5]  }
  0x2f   : > { %v174_v10 = vsub.s32 %v171_v4, %v152_v3  ;;  %s396_s2 = sshll.u32 %s476_s30, 4  ;;  %s397_s2 = int_to_ptr.vmem [resolvable:$false] %s396_s2 }
  0x30   : > { %v154_v11 = vrot.slane %v149_v9, %v153_v5  ;;  %v158_v12 = vrot.slane %v149_v9, %v157_v6  ;;  %v162_v13 = vrot.slane %v149_v9, %v161_v7  ;;  %v166_v14 = vrot.slane %v149_v9, %v165_v8  ;;  %p394_p11 = pnand %p393_p8, %p538_p9  ;;  %s398_s3 = scalar_lea.vmem %s397_s2, 256 }
  0x31   : > { %p399_p0 = scmp.lt.s32.totalorder %s204_s23, %s397_s2  ;;  %p400_p1 = scmp.lt.s32.totalorder %s398_s3, %s392_s29 }
  0x32   : > { %v167_v15 = vcombine.low %v154_v11, %v158_v12  ;;  %v168_v16 = vcombine.low %v162_v13, %v166_v14  ;;  %p395_p12 = pneg %p394_p11 }
  0x33   : > { %p401_p2 = por %p400_p1, %p399_p0 }
  0x34   : > { %v175_v17 = vrot.slane %v167_v15, %v174_v10  ;;  %v182_v18 = vrot.slane %v168_v16, %v174_v10 }
  0x35   : > { %p402_p3 = pnand %p401_p2, %p395_p12 }
  0x36   : > { %v183_v19 = vcombine.low %v175_v17, %v182_v18 }
  0x38   : > { %185 = vst [vmem:[%s146_s18] sm:$0xff] %v183_v19 }
  0x39   : > { %405 = shalt.err (!%p402_p3)
}
  0x3a   : > { %s406_s9 = scalar_lea.hbm %s201_s27, 128  ;;  %s410_s12 = scalar_lea.hbm %s623_s1, 256 }
  0x3b   : > { %p407_p5 = scmp.ne.s32.totalorder %s201_s27, %s406_s9  ;;  %p411_p10 = scmp.lt.s32.totalorder %s201_s27, %s623_s1 }
  0x3c   : > { %p412_p4 = scmp.lt.s32.totalorder %s410_s12, %s406_s9 }
  0x3d   : > { %p408_p6 = pnand %p407_p5, %p538_p9 }
  0x3e   : > { %p413_p13 = por %p412_p4, %p411_p10 }
  0x3f   : > { %p409_p7 = pneg %p408_p6 }
  0x41   : > { %p414_p8 = pnand %p413_p13, %p409_p7 }
  0x43   : > { %417 = shalt.err (!%p414_p8)
}
  0x44   : > { %303 = dma.vmem_to_hbm [thread:$0]  (%p538_p9), %s204_s23, 128, %s201_s27, %s187_s28  }
  0x45 PF: > { %s215_s16 = sand.u32 1, %s452_s6   ;;  %p629_p11 = scmp.ne.s32.totalorder %s627_s21, 0 }
  0x46   : > { %p630_p12 = scmp.ge.s32.totalorder %s472_s11, 2  ;;  %s216_s17 = scalar_lea.sflag [#allocation4], %s215_s16 }
  0x48   : > { %p310_p0 = pnand %p630_p12, %p629_p11 }
  0x4a   : > { %p311_p1 = pneg %p310_p0 }
  0x4c   : > { %447 = dma.done.wait (%p311_p1), %s216_s17, 128  }
  0x4d   : > { %449 = vsyncadd (%p311_p1), %s216_s17, 4294967168  ;;  %s17_s11 = sadd.s32 1, %s472_s11   ;;  %s631_s6 = smov %s456_s7 }
  0x4e   : > { %p14_p2 = scmp.ge.s32.totalorder %s17_s11, 4   ;;  %s632_s7 = smov %s460_s8 }
  0x4f   : > { %s633_s8 = smov %s543_s20  ;;  %s634_s9 = smov %s468_s10 }
  0x50   : > { %s635_s10 = smov %s637_s14  ;;  %16 = sbr.rel (!%p14_p2) target bundleno = 6 (0x6), region = 69 }
  0x55   :  { %221 = vsyncpa [#allocation3], 1 }
  0x56   :  { %223 = vsyncpa [#allocation3 + $0x1], 1 }
  0x57   :  { %224 = vsyncpa [#allocation4], 1 }
  0x58   :  { %226 = vsyncpa [#allocation4 + $0x1], 1 }

</bundles_post_ra>
